<compile_context>
chip_gen: v5e
topology: v5e:2x2
jax: 0.10.0
libtpu: 0.0.40
codegen_flags: <defaults>
</compile_context>

<pallas_src>
import functools

import jax
import jax.numpy as jnp
from jax import lax
from jax.experimental import pallas as pl
from jax.experimental.pallas import tpu as pltpu


# ----------------------------------------------------------------------------
# Fused kernel: QKV projection + multi-head attention + output projection+bias
# ----------------------------------------------------------------------------
def _fused_attention_kernel(x_ref, wqkv_ref, wo_ref, bo_ref, o_ref, *,
                            batch_block, seq_len, heads, dim_head, inner_dim,
                            exp_in_bf16):
    # Per grid step (`batch_block` batch elements):
    #   x_ref    : (batch_block*seq_len, 3*q_dim)  rows of concat([q|k|v], -1)
    #   wqkv_ref : (3*q_dim, 3*inner_dim)          blockdiag(scale*Wq, Wk, Wv)
    #   wo_ref   : (inner_dim, out_dim_p)          lane-padded output proj
    #   bo_ref   : (1, out_dim_p)                  lane-padded bias (f32)
    #   o_ref    : (batch_block*seq_len, out_dim_p)
    cd = x_ref.dtype            # MXU operand dtype (bf16 on the fast path)
    f32 = jnp.float32
    n = seq_len
    out_dim_p = o_ref.shape[-1]

    # Fused q/k/v projection: ONE MXU matmul, M = batch_block*n, N = 3*inner.
    qkv = jnp.dot(x_ref[...], wqkv_ref[...],
                  preferred_element_type=f32).astype(cd)

    bias = bo_ref[...].astype(f32)          # hoisted (1, out_dim_p)

    # batch_block and heads are small Python ints -> statically unrolled loop,
    # all slices static.  TODO(synk): VMEM scratch accumulator +
    # lax.fori_loop(unroll=True) when heads / rows grow (vreg pressure).
    for bi in range(batch_block):
        r0 = bi * n
        qkv_b = qkv[r0:r0 + n, :]
        acc = jnp.zeros((n, out_dim_p), f32)

        for h in range(heads):
            lo = h * dim_head
            qh = qkv_b[:, lo:lo + dim_head]
            kh = qkv_b[:, inner_dim + lo:inner_dim + lo + dim_head]
            vh = qkv_b[:, 2 * inner_dim + lo:2 * inner_dim + lo + dim_head]

            # q @ k^T without materializing a transpose: contract last dims.
            dots = lax.dot_general(qh, kh,
                                   dimension_numbers=(((1,), (1,)), ((), ())),
                                   preferred_element_type=f32)

            # Max-subtracted softmax; exp optionally in bf16 (v6e/v7x EUP),
            # sum / normalisation / accumulation always in f32 (v5e-safe).
            m = jnp.max(dots, axis=-1, keepdims=True)
            s = dots - m
            if exp_in_bf16:
                p = jnp.exp(s.astype(jnp.bfloat16)).astype(f32)
            else:
                p = jnp.exp(s)
            attn = p * pl.reciprocal(jnp.sum(p, axis=-1, keepdims=True),
                                     approx=True)

            ctx = jnp.dot(attn.astype(cd), vh,
                          preferred_element_type=f32)            # (n, dim_head)
            # Fold this head's slice of the output projection into the acc.
            acc = acc + jnp.dot(ctx.astype(cd), wo_ref[lo:lo + dim_head, :],
                                preferred_element_type=f32)

        # Lane-dense (multiple-of-128) unmasked store for this batch element.
        o_ref[r0:r0 + n, :] = (acc + bias).astype(o_ref.dtype)


# ----------------------------------------------------------------------------
# Wrapper
# ----------------------------------------------------------------------------
def _round_up(x, m):
    return ((x + m - 1) // m) * m


def _pick_batch_block(b, n, target_rows=256):
    # Biggest divisor of b whose row count (bb*n) stays near `target_rows`.
    bb = max(1, min(b, max(1, target_rows // max(n, 1))))
    while b % bb:
        bb -= 1
    return bb


def attention_forward(q, k, v, params, *, heads, dim_head, compute_dtype=None,
                      exp_in_bf16=False, batch_block=None):
    """Pallas implementation of Attention.forward (create_heads=True path).

    compute_dtype: optional dtype (e.g. jnp.bfloat16) for MXU matmul operands;
    accumulation and softmax math stay in float32 in-kernel.
    exp_in_bf16:   compute the softmax exp in bf16 (v6e/v7x); keep False on v5e.
    """
    b, n, q_dim = q.shape
    inner_dim = heads * dim_head
    scale = dim_head ** (-0.5)
    out_dtype = q.dtype

    wq, wk, wv = params["wq"], params["wk"], params["wv"]   # [q_dim, inner_dim]
    wo, bo = params["wo"], params["bo"]                     # [inner, out], [out]
    out_dim = wo.shape[1]
    out_dim_p = _round_up(out_dim, 128)        # lane-dense output stores

    f32 = jnp.float32
    # Block-diagonal fused projection weight; scale folded into the Wq block.
    # concat([q|k|v], -1) @ blockdiag == [scale*(q@Wq) | k@Wk | v@Wv], which is
    # correct for cross-attention with distinct q/k/v.
    w_qkv = jnp.zeros((3 * q_dim, 3 * inner_dim), f32)
    w_qkv = w_qkv.at[:q_dim, :inner_dim].set(wq.astype(f32) * scale)
    w_qkv = w_qkv.at[q_dim:2 * q_dim, inner_dim:2 * inner_dim].set(wk.astype(f32))
    w_qkv = w_qkv.at[2 * q_dim:, 2 * inner_dim:].set(wv.astype(f32))

    wo_p = jnp.zeros((inner_dim, out_dim_p), f32).at[:, :out_dim].set(wo.astype(f32))
    bo_p = jnp.zeros((1, out_dim_p), f32).at[:, :out_dim].set(
        bo.reshape(1, -1).astype(f32))

    # Concatenate q|k|v on the feature axis and flatten rows so the projection
    # fills the MXU M dimension with batch_block*n rows per grid step.
    x = jnp.concatenate([q, k, v], axis=-1).reshape(b * n, 3 * q_dim)

    cd = compute_dtype if compute_dtype is not None else out_dtype
    x = x.astype(cd)
    w_qkv = w_qkv.astype(cd)
    wo_p = wo_p.astype(cd)
    # bo_p stays f32: bias added once in f32 inside the kernel.

    bb = batch_block if batch_block is not None else _pick_batch_block(b, n)
    assert b % bb == 0, "batch_block must divide batch"
    rows = bb * n
    grid = (b // bb,)

    kernel = functools.partial(
        _fused_attention_kernel, batch_block=bb, seq_len=n, heads=heads,
        dim_head=dim_head, inner_dim=inner_dim, exp_in_bf16=exp_in_bf16)

    out_p = pl.pallas_call(
        kernel,
        out_shape=jax.ShapeDtypeStruct((b * n, out_dim_p), out_dtype),
        grid=grid,
        in_specs=[
            pl.BlockSpec((rows, 3 * q_dim), lambda i: (i, 0)),
            pl.BlockSpec((3 * q_dim, 3 * inner_dim), lambda i: (0, 0)),
            pl.BlockSpec((inner_dim, out_dim_p), lambda i: (0, 0)),
            pl.BlockSpec((1, out_dim_p), lambda i: (0, 0)),
        ],
        out_specs=pl.BlockSpec((rows, out_dim_p), lambda i: (i, 0)),
        compiler_params=pltpu.CompilerParams(
            dimension_semantics=("parallel",)),
    )(x, w_qkv, wo_p, bo_p)

    # Strip the lane padding and restore (b, n, out_dim).
    return out_p.reshape(b, n, out_dim_p)[:, :, :out_dim]


# ----------------------------------------------------------------------------
# Pure-JAX reference (mirrors the PyTorch forward) for correctness checks
# ----------------------------------------------------------------------------
def attention_reference(q, k, v, params, *, heads, dim_head):
    b, n, q_dim = q.shape
    scale = dim_head ** (-0.5)

    def to_heads(t):  # 'b n (h d) -> b h n d'
        return jnp.transpose(t.reshape(b, n, heads, dim_head), (0, 2, 1, 3))

    qh = to_heads(q @ params["wq"])
    kh = to_heads(k @ params["wk"])
    vh = to_heads(v @ params["wv"])

    dots = jnp.einsum("bhnd,bhmd->bhnm", qh, kh) * scale
    attn = jax.nn.softmax(dots, axis=-1)
    out = jnp.einsum("bhnm,bhmd->bhnd", attn, vh)
    out = jnp.transpose(out, (0, 2, 1, 3)).reshape(b, n, heads * dim_head)
    return out @ params["wo"] + params["bo"]


if __name__ == "__main__":
    # Small shapes consistent with the module.
    batch, seq, q_dim = 2, 8, 32
    heads, dim_head = 4, 16
    inner_dim = heads * dim_head
    out_dim = q_dim                   # project_out path: Linear(inner_dim, q_dim)

    key = jax.random.PRNGKey(0)
    k_q, k_k, k_v, k_wq, k_wk, k_wv, k_wo, k_bo = jax.random.split(key, 8)

    q = jax.random.normal(k_q, (batch, seq, q_dim), jnp.float32)
    k = jax.random.normal(k_k, (batch, seq, q_dim), jnp.float32)
    v = jax.random.normal(k_v, (batch, seq, q_dim), jnp.float32)

    # nn.Linear weights stored as [in, out] so that y = x @ W.
    params = {
        "wq": jax.random.normal(k_wq, (q_dim, inner_dim), jnp.float32) * 0.05,
        "wk": jax.random.normal(k_wk, (q_dim, inner_dim), jnp.float32) * 0.05,
        "wv": jax.random.normal(k_wv, (q_dim, inner_dim), jnp.float32) * 0.05,
        "wo": jax.random.normal(k_wo, (inner_dim, out_dim), jnp.float32) * 0.05,
        "bo": jax.random.normal(k_bo, (out_dim,), jnp.float32) * 0.05,
    }

    ref = attention_reference(q, k, v, params, heads=heads, dim_head=dim_head)

    # Full-precision path (semantics check; approx reciprocal -> modest tol).
    out_f32 = attention_forward(q, k, v, params, heads=heads, dim_head=dim_head)
    out_f32 = jax.block_until_ready(out_f32)
    assert out_f32.shape == (batch, seq, out_dim)
    assert jnp.allclose(out_f32, ref, atol=5e-3, rtol=5e-3), "f32 path mismatch"

    # bf16-operand fast path (f32 accumulation + f32 softmax in-kernel).
    out_bf16 = attention_forward(q, k, v, params, heads=heads,
                                 dim_head=dim_head,
                                 compute_dtype=jnp.bfloat16)
    out_bf16 = jax.block_until_ready(out_bf16)
    assert out_bf16.shape == (batch, seq, out_dim)
    assert jnp.allclose(out_bf16.astype(jnp.float32), ref,
                        atol=5e-2, rtol=5e-2), "bf16 path mismatch"

    print("KERNEL_OK")
</pallas_src>

<mosaic_0001>
module attributes {stable_mosaic.version = 11 : i64} {
  func.func @_fused_attention_kernel(%arg0: i32, %arg1: memref<16x96xf32, #tpu.memory_space<vmem>>, %arg2: memref<96x192xf32, #tpu.memory_space<vmem>>, %arg3: memref<64x128xf32, #tpu.memory_space<vmem>>, %arg4: memref<1x128xf32, #tpu.memory_space<vmem>>, %arg5: memref<16x128xf32, #tpu.memory_space<vmem>>) attributes {dimension_semantics = [#tpu.dimension_semantics<parallel>], iteration_bounds = array<i64: 1>, scalar_prefetch = 0 : i64, scratch_operands = 0 : i64, tpu.core_type = #tpu.core_type<tc>, window_params = [{transform_indices = @transform_0, window_bounds = array<i64: 16, 96>}, {pipeline_mode = #tpu.pipeline_mode<synchronous>, transform_indices = @transform_1, window_bounds = array<i64: 96, 192>}, {pipeline_mode = #tpu.pipeline_mode<synchronous>, transform_indices = @transform_2, window_bounds = array<i64: 64, 128>}, {pipeline_mode = #tpu.pipeline_mode<synchronous>, transform_indices = @transform_3, window_bounds = array<i64: 1, 128>}, {transform_indices = @transform_4, window_bounds = array<i64: 16, 128>}]} {
    %c0 = arith.constant 0 : index
    %c0_0 = arith.constant 0 : index
    %0 = vector.load %arg1[%c0, %c0_0] : memref<16x96xf32, #tpu.memory_space<vmem>>, vector<16x96xf32>
    %c0_1 = arith.constant 0 : index
    %c0_2 = arith.constant 0 : index
    %1 = vector.load %arg2[%c0_1, %c0_2] : memref<96x192xf32, #tpu.memory_space<vmem>>, vector<96x192xf32>
    %cst = arith.constant dense<0.000000e+00> : vector<16x192xf32>
    %2 = tpu.matmul %0, %1, %cst {dimension_numbers = #tpu.dot_dimension_numbers<[1], [0], [0], [1], [0, 0, 1, 1], [], []>} : vector<16x96xf32>, vector<96x192xf32>, vector<16x192xf32> -> vector<16x192xf32>
    %c0_3 = arith.constant 0 : index
    %c0_4 = arith.constant 0 : index
    %3 = vector.load %arg4[%c0_3, %c0_4] : memref<1x128xf32, #tpu.memory_space<vmem>>, vector<1x128xf32>
    %4 = vector.extract_strided_slice %2 {offsets = [0, 0], sizes = [8, 192], strides = [1, 1]} : vector<16x192xf32> to vector<8x192xf32>
    %cst_5 = arith.constant 0.000000e+00 : f32
    %5 = vector.broadcast %cst_5 : f32 to vector<8x128xf32>
    %6 = vector.extract_strided_slice %4 {offsets = [0, 0], sizes = [8, 16], strides = [1, 1]} : vector<8x192xf32> to vector<8x16xf32>
    %7 = vector.extract_strided_slice %4 {offsets = [0, 64], sizes = [8, 16], strides = [1, 1]} : vector<8x192xf32> to vector<8x16xf32>
    %8 = vector.extract_strided_slice %4 {offsets = [0, 128], sizes = [8, 16], strides = [1, 1]} : vector<8x192xf32> to vector<8x16xf32>
    %cst_6 = arith.constant dense<0.000000e+00> : vector<8x8xf32>
    %9 = tpu.matmul %6, %7, %cst_6 {dimension_numbers = #tpu.dot_dimension_numbers<[1], [1], [0], [0], [0, 0, 1, 0], [], []>} : vector<8x16xf32>, vector<8x16xf32>, vector<8x8xf32> -> vector<8x8xf32>
    %cst_7 = arith.constant dense<0xFF800000> : vector<8xf32>
    %10 = vector.multi_reduction <maximumf>, %9, %cst_7 [1] : vector<8x8xf32> to vector<8xf32>
    %11 = vector.shape_cast %10 : vector<8xf32> to vector<8x1xf32>
    %12 = vector.broadcast %11 : vector<8x1xf32> to vector<8x8xf32>
    %13 = arith.subf %9, %12 : vector<8x8xf32>
    %14 = math.exp %13 : vector<8x8xf32>
    %cst_8 = arith.constant dense<0.000000e+00> : vector<8xf32>
    %15 = vector.multi_reduction <add>, %14, %cst_8 [1] : vector<8x8xf32> to vector<8xf32>
    %16 = vector.shape_cast %15 : vector<8xf32> to vector<8x1xf32>
    %17 = tpu.reciprocal %16 {approx = true} : vector<8x1xf32> -> vector<8x1xf32>
    %18 = vector.broadcast %17 : vector<8x1xf32> to vector<8x8xf32>
    %19 = arith.mulf %14, %18 : vector<8x8xf32>
    %cst_9 = arith.constant dense<0.000000e+00> : vector<8x16xf32>
    %20 = tpu.matmul %19, %8, %cst_9 {dimension_numbers = #tpu.dot_dimension_numbers<[1], [0], [0], [1], [0, 0, 1, 1], [], []>} : vector<8x8xf32>, vector<8x16xf32>, vector<8x16xf32> -> vector<8x16xf32>
    %c0_10 = arith.constant 0 : index
    %c0_11 = arith.constant 0 : index
    %21 = vector.load %arg3[%c0_10, %c0_11] : memref<64x128xf32, #tpu.memory_space<vmem>>, vector<16x128xf32>
    %cst_12 = arith.constant dense<0.000000e+00> : vector<8x128xf32>
    %22 = tpu.matmul %20, %21, %cst_12 {dimension_numbers = #tpu.dot_dimension_numbers<[1], [0], [0], [1], [0, 0, 1, 1], [], []>} : vector<8x16xf32>, vector<16x128xf32>, vector<8x128xf32> -> vector<8x128xf32>
    %23 = arith.addf %5, %22 : vector<8x128xf32>
    %24 = vector.extract_strided_slice %4 {offsets = [0, 16], sizes = [8, 16], strides = [1, 1]} : vector<8x192xf32> to vector<8x16xf32>
    %25 = vector.extract_strided_slice %4 {offsets = [0, 80], sizes = [8, 16], strides = [1, 1]} : vector<8x192xf32> to vector<8x16xf32>
    %26 = vector.extract_strided_slice %4 {offsets = [0, 144], sizes = [8, 16], strides = [1, 1]} : vector<8x192xf32> to vector<8x16xf32>
    %cst_13 = arith.constant dense<0.000000e+00> : vector<8x8xf32>
    %27 = tpu.matmul %24, %25, %cst_13 {dimension_numbers = #tpu.dot_dimension_numbers<[1], [1], [0], [0], [0, 0, 1, 0], [], []>} : vector<8x16xf32>, vector<8x16xf32>, vector<8x8xf32> -> vector<8x8xf32>
    %cst_14 = arith.constant dense<0xFF800000> : vector<8xf32>
    %28 = vector.multi_reduction <maximumf>, %27, %cst_14 [1] : vector<8x8xf32> to vector<8xf32>
    %29 = vector.shape_cast %28 : vector<8xf32> to vector<8x1xf32>
    %30 = vector.broadcast %29 : vector<8x1xf32> to vector<8x8xf32>
    %31 = arith.subf %27, %30 : vector<8x8xf32>
    %32 = math.exp %31 : vector<8x8xf32>
    %cst_15 = arith.constant dense<0.000000e+00> : vector<8xf32>
    %33 = vector.multi_reduction <add>, %32, %cst_15 [1] : vector<8x8xf32> to vector<8xf32>
    %34 = vector.shape_cast %33 : vector<8xf32> to vector<8x1xf32>
    %35 = tpu.reciprocal %34 {approx = true} : vector<8x1xf32> -> vector<8x1xf32>
    %36 = vector.broadcast %35 : vector<8x1xf32> to vector<8x8xf32>
    %37 = arith.mulf %32, %36 : vector<8x8xf32>
    %cst_16 = arith.constant dense<0.000000e+00> : vector<8x16xf32>
    %38 = tpu.matmul %37, %26, %cst_16 {dimension_numbers = #tpu.dot_dimension_numbers<[1], [0], [0], [1], [0, 0, 1, 1], [], []>} : vector<8x8xf32>, vector<8x16xf32>, vector<8x16xf32> -> vector<8x16xf32>
    %c16 = arith.constant 16 : index
    %c0_17 = arith.constant 0 : index
    %39 = vector.load %arg3[%c16, %c0_17] : memref<64x128xf32, #tpu.memory_space<vmem>>, vector<16x128xf32>
    %cst_18 = arith.constant dense<0.000000e+00> : vector<8x128xf32>
    %40 = tpu.matmul %38, %39, %cst_18 {dimension_numbers = #tpu.dot_dimension_numbers<[1], [0], [0], [1], [0, 0, 1, 1], [], []>} : vector<8x16xf32>, vector<16x128xf32>, vector<8x128xf32> -> vector<8x128xf32>
    %41 = arith.addf %23, %40 : vector<8x128xf32>
    %42 = vector.extract_strided_slice %4 {offsets = [0, 32], sizes = [8, 16], strides = [1, 1]} : vector<8x192xf32> to vector<8x16xf32>
    %43 = vector.extract_strided_slice %4 {offsets = [0, 96], sizes = [8, 16], strides = [1, 1]} : vector<8x192xf32> to vector<8x16xf32>
    %44 = vector.extract_strided_slice %4 {offsets = [0, 160], sizes = [8, 16], strides = [1, 1]} : vector<8x192xf32> to vector<8x16xf32>
    %cst_19 = arith.constant dense<0.000000e+00> : vector<8x8xf32>
    %45 = tpu.matmul %42, %43, %cst_19 {dimension_numbers = #tpu.dot_dimension_numbers<[1], [1], [0], [0], [0, 0, 1, 0], [], []>} : vector<8x16xf32>, vector<8x16xf32>, vector<8x8xf32> -> vector<8x8xf32>
    %cst_20 = arith.constant dense<0xFF800000> : vector<8xf32>
    %46 = vector.multi_reduction <maximumf>, %45, %cst_20 [1] : vector<8x8xf32> to vector<8xf32>
    %47 = vector.shape_cast %46 : vector<8xf32> to vector<8x1xf32>
    %48 = vector.broadcast %47 : vector<8x1xf32> to vector<8x8xf32>
    %49 = arith.subf %45, %48 : vector<8x8xf32>
    %50 = math.exp %49 : vector<8x8xf32>
    %cst_21 = arith.constant dense<0.000000e+00> : vector<8xf32>
    %51 = vector.multi_reduction <add>, %50, %cst_21 [1] : vector<8x8xf32> to vector<8xf32>
    %52 = vector.shape_cast %51 : vector<8xf32> to vector<8x1xf32>
    %53 = tpu.reciprocal %52 {approx = true} : vector<8x1xf32> -> vector<8x1xf32>
    %54 = vector.broadcast %53 : vector<8x1xf32> to vector<8x8xf32>
    %55 = arith.mulf %50, %54 : vector<8x8xf32>
    %cst_22 = arith.constant dense<0.000000e+00> : vector<8x16xf32>
    %56 = tpu.matmul %55, %44, %cst_22 {dimension_numbers = #tpu.dot_dimension_numbers<[1], [0], [0], [1], [0, 0, 1, 1], [], []>} : vector<8x8xf32>, vector<8x16xf32>, vector<8x16xf32> -> vector<8x16xf32>
    %c32 = arith.constant 32 : index
    %c0_23 = arith.constant 0 : index
    %57 = vector.load %arg3[%c32, %c0_23] : memref<64x128xf32, #tpu.memory_space<vmem>>, vector<16x128xf32>
    %cst_24 = arith.constant dense<0.000000e+00> : vector<8x128xf32>
    %58 = tpu.matmul %56, %57, %cst_24 {dimension_numbers = #tpu.dot_dimension_numbers<[1], [0], [0], [1], [0, 0, 1, 1], [], []>} : vector<8x16xf32>, vector<16x128xf32>, vector<8x128xf32> -> vector<8x128xf32>
    %59 = arith.addf %41, %58 : vector<8x128xf32>
    %60 = vector.extract_strided_slice %4 {offsets = [0, 48], sizes = [8, 16], strides = [1, 1]} : vector<8x192xf32> to vector<8x16xf32>
    %61 = vector.extract_strided_slice %4 {offsets = [0, 112], sizes = [8, 16], strides = [1, 1]} : vector<8x192xf32> to vector<8x16xf32>
    %62 = vector.extract_strided_slice %4 {offsets = [0, 176], sizes = [8, 16], strides = [1, 1]} : vector<8x192xf32> to vector<8x16xf32>
    %cst_25 = arith.constant dense<0.000000e+00> : vector<8x8xf32>
    %63 = tpu.matmul %60, %61, %cst_25 {dimension_numbers = #tpu.dot_dimension_numbers<[1], [1], [0], [0], [0, 0, 1, 0], [], []>} : vector<8x16xf32>, vector<8x16xf32>, vector<8x8xf32> -> vector<8x8xf32>
    %cst_26 = arith.constant dense<0xFF800000> : vector<8xf32>
    %64 = vector.multi_reduction <maximumf>, %63, %cst_26 [1] : vector<8x8xf32> to vector<8xf32>
    %65 = vector.shape_cast %64 : vector<8xf32> to vector<8x1xf32>
    %66 = vector.broadcast %65 : vector<8x1xf32> to vector<8x8xf32>
    %67 = arith.subf %63, %66 : vector<8x8xf32>
    %68 = math.exp %67 : vector<8x8xf32>
    %cst_27 = arith.constant dense<0.000000e+00> : vector<8xf32>
    %69 = vector.multi_reduction <add>, %68, %cst_27 [1] : vector<8x8xf32> to vector<8xf32>
    %70 = vector.shape_cast %69 : vector<8xf32> to vector<8x1xf32>
    %71 = tpu.reciprocal %70 {approx = true} : vector<8x1xf32> -> vector<8x1xf32>
    %72 = vector.broadcast %71 : vector<8x1xf32> to vector<8x8xf32>
    %73 = arith.mulf %68, %72 : vector<8x8xf32>
    %cst_28 = arith.constant dense<0.000000e+00> : vector<8x16xf32>
    %74 = tpu.matmul %73, %62, %cst_28 {dimension_numbers = #tpu.dot_dimension_numbers<[1], [0], [0], [1], [0, 0, 1, 1], [], []>} : vector<8x8xf32>, vector<8x16xf32>, vector<8x16xf32> -> vector<8x16xf32>
    %c48 = arith.constant 48 : index
    %c0_29 = arith.constant 0 : index
    %75 = vector.load %arg3[%c48, %c0_29] : memref<64x128xf32, #tpu.memory_space<vmem>>, vector<16x128xf32>
    %cst_30 = arith.constant dense<0.000000e+00> : vector<8x128xf32>
    %76 = tpu.matmul %74, %75, %cst_30 {dimension_numbers = #tpu.dot_dimension_numbers<[1], [0], [0], [1], [0, 0, 1, 1], [], []>} : vector<8x16xf32>, vector<16x128xf32>, vector<8x128xf32> -> vector<8x128xf32>
    %77 = arith.addf %59, %76 : vector<8x128xf32>
    %78 = vector.broadcast %3 : vector<1x128xf32> to vector<8x128xf32>
    %79 = arith.addf %77, %78 : vector<8x128xf32>
    %c0_31 = arith.constant 0 : index
    %c0_32 = arith.constant 0 : index
    %80 = vector.load %arg5[%c0_31, %c0_32] : memref<16x128xf32, #tpu.memory_space<vmem>>, vector<8x128xf32>
    tpu.vector_store %arg5[%c0_31, %c0_32], %79 {strides = array<i32>} : memref<16x128xf32, #tpu.memory_space<vmem>>, vector<8x128xf32>,
    %81 = vector.extract_strided_slice %2 {offsets = [8, 0], sizes = [8, 192], strides = [1, 1]} : vector<16x192xf32> to vector<8x192xf32>
    %cst_33 = arith.constant 0.000000e+00 : f32
    %82 = vector.broadcast %cst_33 : f32 to vector<8x128xf32>
    %83 = vector.extract_strided_slice %81 {offsets = [0, 0], sizes = [8, 16], strides = [1, 1]} : vector<8x192xf32> to vector<8x16xf32>
    %84 = vector.extract_strided_slice %81 {offsets = [0, 64], sizes = [8, 16], strides = [1, 1]} : vector<8x192xf32> to vector<8x16xf32>
    %85 = vector.extract_strided_slice %81 {offsets = [0, 128], sizes = [8, 16], strides = [1, 1]} : vector<8x192xf32> to vector<8x16xf32>
    %cst_34 = arith.constant dense<0.000000e+00> : vector<8x8xf32>
    %86 = tpu.matmul %83, %84, %cst_34 {dimension_numbers = #tpu.dot_dimension_numbers<[1], [1], [0], [0], [0, 0, 1, 0], [], []>} : vector<8x16xf32>, vector<8x16xf32>, vector<8x8xf32> -> vector<8x8xf32>
    %cst_35 = arith.constant dense<0xFF800000> : vector<8xf32>
    %87 = vector.multi_reduction <maximumf>, %86, %cst_35 [1] : vector<8x8xf32> to vector<8xf32>
    %88 = vector.shape_cast %87 : vector<8xf32> to vector<8x1xf32>
    %89 = vector.broadcast %88 : vector<8x1xf32> to vector<8x8xf32>
    %90 = arith.subf %86, %89 : vector<8x8xf32>
    %91 = math.exp %90 : vector<8x8xf32>
    %cst_36 = arith.constant dense<0.000000e+00> : vector<8xf32>
    %92 = vector.multi_reduction <add>, %91, %cst_36 [1] : vector<8x8xf32> to vector<8xf32>
    %93 = vector.shape_cast %92 : vector<8xf32> to vector<8x1xf32>
    %94 = tpu.reciprocal %93 {approx = true} : vector<8x1xf32> -> vector<8x1xf32>
    %95 = vector.broadcast %94 : vector<8x1xf32> to vector<8x8xf32>
    %96 = arith.mulf %91, %95 : vector<8x8xf32>
    %cst_37 = arith.constant dense<0.000000e+00> : vector<8x16xf32>
    %97 = tpu.matmul %96, %85, %cst_37 {dimension_numbers = #tpu.dot_dimension_numbers<[1], [0], [0], [1], [0, 0, 1, 1], [], []>} : vector<8x8xf32>, vector<8x16xf32>, vector<8x16xf32> -> vector<8x16xf32>
    %c0_38 = arith.constant 0 : index
    %c0_39 = arith.constant 0 : index
    %98 = vector.load %arg3[%c0_38, %c0_39] : memref<64x128xf32, #tpu.memory_space<vmem>>, vector<16x128xf32>
    %cst_40 = arith.constant dense<0.000000e+00> : vector<8x128xf32>
    %99 = tpu.matmul %97, %98, %cst_40 {dimension_numbers = #tpu.dot_dimension_numbers<[1], [0], [0], [1], [0, 0, 1, 1], [], []>} : vector<8x16xf32>, vector<16x128xf32>, vector<8x128xf32> -> vector<8x128xf32>
    %100 = arith.addf %82, %99 : vector<8x128xf32>
    %101 = vector.extract_strided_slice %81 {offsets = [0, 16], sizes = [8, 16], strides = [1, 1]} : vector<8x192xf32> to vector<8x16xf32>
    %102 = vector.extract_strided_slice %81 {offsets = [0, 80], sizes = [8, 16], strides = [1, 1]} : vector<8x192xf32> to vector<8x16xf32>
    %103 = vector.extract_strided_slice %81 {offsets = [0, 144], sizes = [8, 16], strides = [1, 1]} : vector<8x192xf32> to vector<8x16xf32>
    %cst_41 = arith.constant dense<0.000000e+00> : vector<8x8xf32>
    %104 = tpu.matmul %101, %102, %cst_41 {dimension_numbers = #tpu.dot_dimension_numbers<[1], [1], [0], [0], [0, 0, 1, 0], [], []>} : vector<8x16xf32>, vector<8x16xf32>, vector<8x8xf32> -> vector<8x8xf32>
    %cst_42 = arith.constant dense<0xFF800000> : vector<8xf32>
    %105 = vector.multi_reduction <maximumf>, %104, %cst_42 [1] : vector<8x8xf32> to vector<8xf32>
    %106 = vector.shape_cast %105 : vector<8xf32> to vector<8x1xf32>
    %107 = vector.broadcast %106 : vector<8x1xf32> to vector<8x8xf32>
    %108 = arith.subf %104, %107 : vector<8x8xf32>
    %109 = math.exp %108 : vector<8x8xf32>
    %cst_43 = arith.constant dense<0.000000e+00> : vector<8xf32>
    %110 = vector.multi_reduction <add>, %109, %cst_43 [1] : vector<8x8xf32> to vector<8xf32>
    %111 = vector.shape_cast %110 : vector<8xf32> to vector<8x1xf32>
    %112 = tpu.reciprocal %111 {approx = true} : vector<8x1xf32> -> vector<8x1xf32>
    %113 = vector.broadcast %112 : vector<8x1xf32> to vector<8x8xf32>
    %114 = arith.mulf %109, %113 : vector<8x8xf32>
    %cst_44 = arith.constant dense<0.000000e+00> : vector<8x16xf32>
    %115 = tpu.matmul %114, %103, %cst_44 {dimension_numbers = #tpu.dot_dimension_numbers<[1], [0], [0], [1], [0, 0, 1, 1], [], []>} : vector<8x8xf32>, vector<8x16xf32>, vector<8x16xf32> -> vector<8x16xf32>
    %c16_45 = arith.constant 16 : index
    %c0_46 = arith.constant 0 : index
    %116 = vector.load %arg3[%c16_45, %c0_46] : memref<64x128xf32, #tpu.memory_space<vmem>>, vector<16x128xf32>
    %cst_47 = arith.constant dense<0.000000e+00> : vector<8x128xf32>
    %117 = tpu.matmul %115, %116, %cst_47 {dimension_numbers = #tpu.dot_dimension_numbers<[1], [0], [0], [1], [0, 0, 1, 1], [], []>} : vector<8x16xf32>, vector<16x128xf32>, vector<8x128xf32> -> vector<8x128xf32>
    %118 = arith.addf %100, %117 : vector<8x128xf32>
    %119 = vector.extract_strided_slice %81 {offsets = [0, 32], sizes = [8, 16], strides = [1, 1]} : vector<8x192xf32> to vector<8x16xf32>
    %120 = vector.extract_strided_slice %81 {offsets = [0, 96], sizes = [8, 16], strides = [1, 1]} : vector<8x192xf32> to vector<8x16xf32>
    %121 = vector.extract_strided_slice %81 {offsets = [0, 160], sizes = [8, 16], strides = [1, 1]} : vector<8x192xf32> to vector<8x16xf32>
    %cst_48 = arith.constant dense<0.000000e+00> : vector<8x8xf32>
    %122 = tpu.matmul %119, %120, %cst_48 {dimension_numbers = #tpu.dot_dimension_numbers<[1], [1], [0], [0], [0, 0, 1, 0], [], []>} : vector<8x16xf32>, vector<8x16xf32>, vector<8x8xf32> -> vector<8x8xf32>
    %cst_49 = arith.constant dense<0xFF800000> : vector<8xf32>
    %123 = vector.multi_reduction <maximumf>, %122, %cst_49 [1] : vector<8x8xf32> to vector<8xf32>
    %124 = vector.shape_cast %123 : vector<8xf32> to vector<8x1xf32>
    %125 = vector.broadcast %124 : vector<8x1xf32> to vector<8x8xf32>
    %126 = arith.subf %122, %125 : vector<8x8xf32>
    %127 = math.exp %126 : vector<8x8xf32>
    %cst_50 = arith.constant dense<0.000000e+00> : vector<8xf32>
    %128 = vector.multi_reduction <add>, %127, %cst_50 [1] : vector<8x8xf32> to vector<8xf32>
    %129 = vector.shape_cast %128 : vector<8xf32> to vector<8x1xf32>
    %130 = tpu.reciprocal %129 {approx = true} : vector<8x1xf32> -> vector<8x1xf32>
    %131 = vector.broadcast %130 : vector<8x1xf32> to vector<8x8xf32>
    %132 = arith.mulf %127, %131 : vector<8x8xf32>
    %cst_51 = arith.constant dense<0.000000e+00> : vector<8x16xf32>
    %133 = tpu.matmul %132, %121, %cst_51 {dimension_numbers = #tpu.dot_dimension_numbers<[1], [0], [0], [1], [0, 0, 1, 1], [], []>} : vector<8x8xf32>, vector<8x16xf32>, vector<8x16xf32> -> vector<8x16xf32>
    %c32_52 = arith.constant 32 : index
    %c0_53 = arith.constant 0 : index
    %134 = vector.load %arg3[%c32_52, %c0_53] : memref<64x128xf32, #tpu.memory_space<vmem>>, vector<16x128xf32>
    %cst_54 = arith.constant dense<0.000000e+00> : vector<8x128xf32>
    %135 = tpu.matmul %133, %134, %cst_54 {dimension_numbers = #tpu.dot_dimension_numbers<[1], [0], [0], [1], [0, 0, 1, 1], [], []>} : vector<8x16xf32>, vector<16x128xf32>, vector<8x128xf32> -> vector<8x128xf32>
    %136 = arith.addf %118, %135 : vector<8x128xf32>
    %137 = vector.extract_strided_slice %81 {offsets = [0, 48], sizes = [8, 16], strides = [1, 1]} : vector<8x192xf32> to vector<8x16xf32>
    %138 = vector.extract_strided_slice %81 {offsets = [0, 112], sizes = [8, 16], strides = [1, 1]} : vector<8x192xf32> to vector<8x16xf32>
    %139 = vector.extract_strided_slice %81 {offsets = [0, 176], sizes = [8, 16], strides = [1, 1]} : vector<8x192xf32> to vector<8x16xf32>
    %cst_55 = arith.constant dense<0.000000e+00> : vector<8x8xf32>
    %140 = tpu.matmul %137, %138, %cst_55 {dimension_numbers = #tpu.dot_dimension_numbers<[1], [1], [0], [0], [0, 0, 1, 0], [], []>} : vector<8x16xf32>, vector<8x16xf32>, vector<8x8xf32> -> vector<8x8xf32>
    %cst_56 = arith.constant dense<0xFF800000> : vector<8xf32>
    %141 = vector.multi_reduction <maximumf>, %140, %cst_56 [1] : vector<8x8xf32> to vector<8xf32>
    %142 = vector.shape_cast %141 : vector<8xf32> to vector<8x1xf32>
    %143 = vector.broadcast %142 : vector<8x1xf32> to vector<8x8xf32>
    %144 = arith.subf %140, %143 : vector<8x8xf32>
    %145 = math.exp %144 : vector<8x8xf32>
    %cst_57 = arith.constant dense<0.000000e+00> : vector<8xf32>
    %146 = vector.multi_reduction <add>, %145, %cst_57 [1] : vector<8x8xf32> to vector<8xf32>
    %147 = vector.shape_cast %146 : vector<8xf32> to vector<8x1xf32>
    %148 = tpu.reciprocal %147 {approx = true} : vector<8x1xf32> -> vector<8x1xf32>
    %149 = vector.broadcast %148 : vector<8x1xf32> to vector<8x8xf32>
    %150 = arith.mulf %145, %149 : vector<8x8xf32>
    %cst_58 = arith.constant dense<0.000000e+00> : vector<8x16xf32>
    %151 = tpu.matmul %150, %139, %cst_58 {dimension_numbers = #tpu.dot_dimension_numbers<[1], [0], [0], [1], [0, 0, 1, 1], [], []>} : vector<8x8xf32>, vector<8x16xf32>, vector<8x16xf32> -> vector<8x16xf32>
    %c48_59 = arith.constant 48 : index
    %c0_60 = arith.constant 0 : index
    %152 = vector.load %arg3[%c48_59, %c0_60] : memref<64x128xf32, #tpu.memory_space<vmem>>, vector<16x128xf32>
    %cst_61 = arith.constant dense<0.000000e+00> : vector<8x128xf32>
    %153 = tpu.matmul %151, %152, %cst_61 {dimension_numbers = #tpu.dot_dimension_numbers<[1], [0], [0], [1], [0, 0, 1, 1], [], []>} : vector<8x16xf32>, vector<16x128xf32>, vector<8x128xf32> -> vector<8x128xf32>
    %154 = arith.addf %136, %153 : vector<8x128xf32>
    %155 = vector.broadcast %3 : vector<1x128xf32> to vector<8x128xf32>
    %156 = arith.addf %154, %155 : vector<8x128xf32>
    %c8 = arith.constant 8 : index
    %c0_62 = arith.constant 0 : index
    %157 = vector.load %arg5[%c8, %c0_62] : memref<16x128xf32, #tpu.memory_space<vmem>>, vector<8x128xf32>
    tpu.vector_store %arg5[%c8, %c0_62], %156 {strides = array<i32>} : memref<16x128xf32, #tpu.memory_space<vmem>>, vector<8x128xf32>,
    return
  }
  func.func @transform_0(%arg0: i32) -> (i32, i32) {
    %c0_i32 = arith.constant 0 : i32
    %c0_i32_0 = arith.constant 0 : i32
    return %arg0, %c0_i32 : i32, i32
  }
  func.func @transform_1(%arg0: i32) -> (i32, i32) {
    %c0_i32 = arith.constant 0 : i32
    %c0_i32_0 = arith.constant 0 : i32
    %c0_i32_1 = arith.constant 0 : i32
    return %c0_i32, %c0_i32_0 : i32, i32
  }
  func.func @transform_2(%arg0: i32) -> (i32, i32) {
    %c0_i32 = arith.constant 0 : i32
    %c0_i32_0 = arith.constant 0 : i32
    %c0_i32_1 = arith.constant 0 : i32
    return %c0_i32, %c0_i32_0 : i32, i32
  }
  func.func @transform_3(%arg0: i32) -> (i32, i32) {
    %c0_i32 = arith.constant 0 : i32
    %c0_i32_0 = arith.constant 0 : i32
    %c0_i32_1 = arith.constant 0 : i32
    return %c0_i32, %c0_i32_0 : i32, i32
  }
  func.func @transform_4(%arg0: i32) -> (i32, i32) {
    %c0_i32 = arith.constant 0 : i32
    %c0_i32_0 = arith.constant 0 : i32
    return %arg0, %c0_i32 : i32, i32
  }
}

</mosaic_0001>

<bundles_post_ra>
// kernel: tpu_custom_call.1
= control target key start
LH: loop header
LB: loop body
LE: loop exit
PB: predicated region body
PF: predicated region fallthrough
CT: control target
= control target key end

     0   :  { %9 = vsyncpa [#allocation3], 0  ;;  %s1263_s0 = inlined_call_operand.hbm [shape: f32[16,96], index: 0, kind: input, shape index: {}]   ;;  %s1264_s1 = inlined_call_operand.hbm [shape: f32[96,192], index: 1, kind: input, shape index: {}]   ;;  %s1265_s2 = inlined_call_operand.hbm [shape: f32[64,128], index: 2, kind: input, shape index: {}]   ;;  %s1266_s3 = inlined_call_operand.vmem [shape: f32[1,128], index: 3, kind: input, shape index: {}]   ;;  %s1267_s4 = inlined_call_operand.hbm [shape: f32[16,128], index: 4, kind: output, shape index: {}]  }
   0x1   :  { %10 = vsyncpa [#allocation6], 0  ;;  %s29_s17 = sshll.u32 %s1264_s1, 4  ;;  %s30_s17 = int_to_ptr.hbm [resolvable:$true] %s29_s17 }
   0x2   :  { %11 = vsyncpa [#allocation4], 0  ;;  %s1077_s18 = smov [#allocation5]   ;;  %s16_s22 = sshll.u32 %s1263_s0, 4  ;;  %s17_s22 = int_to_ptr.hbm [resolvable:$true] %s16_s22 }
   0x3   :  { %s31_s19 = sshll.u32 %s1077_s18, 4  ;;  %s1078_s23 = smov 256   ;;  %s32_s19 = int_to_ptr.vmem [resolvable:$true] %s31_s19 }
   0x4   :  { %s1079_s24 = smov 16   ;;  %s1080_s25 = smov [#allocation2]  }
   0x5   :  { %37 = dma.hbm_to_vmem [thread:$0]  %s30_s17, 3072, %s32_s19, [#allocation6], %s1078_s23, %s1078_s23, %s1079_s24  }
   0x6   :  { %s18_s26 = sshll.u32 %s1080_s25, 4  ;;  %s1081_s27 = smov 128   ;;  %s19_s26 = int_to_ptr.vmem [resolvable:$true] %s18_s26 }
   0x7   :  { %s1082_s28 = smov 8   ;;  %s42_s30 = sshll.u32 %s1265_s2, 4  ;;  %s43_s30 = int_to_ptr.hbm [resolvable:$true] %s42_s30 }
   0x8   :  { %24 = dma.hbm_to_vmem [thread:$0]  %s17_s22, 256, %s19_s26, [#allocation3], %s1081_s27, %s1081_s27, %s1082_s28  }
   0x9   :  { %s1083_s0 = smov [#allocation7]  }
   0xa   :  { %s44_s5 = sshll.u32 %s1083_s0, 4  ;;  %s45_s5 = int_to_ptr.vmem [resolvable:$true] %s44_s5 }
   0xb   :  { %50 = dma.hbm_to_vmem [thread:$0]  %s43_s30, 1024, %s45_s5, [#allocation6], %s1081_s27, %s1081_s27, %s1082_s28  }
   0xc   :  { %1071 = dma.done.wait [#allocation3], 256  }
   0xd   :  { %1072 = vsyncadd [#allocation3], 4294967040 }
   0xe   :  { %1073 = dma.done.wait [#allocation6], 4096  }
   0xf   :  { %1074 = vsyncadd [#allocation6], 4294963200  ;;  %v89_v0 = vld [vmem:[#allocation5 + $0xb0] sm:$0xff]  ;;  %v87_v1 = vld [vmem:[#allocation5 + $0xa0] sm:$0xff]  ;;  %vm91_vm0 = vcmask 785408   ;;  %s1084_s2 = smov 112  }
  0x10   :  { %102 = vmatpush.msra.mxu0 %v89_v0  ;;  %v85_v2 = vld [vmem:[#allocation5 + $0x90] sm:$0xff]  ;;  %v83_v3 = vld [vmem:[#allocation5 + $0x80] sm:$0xff]  ;;  %s1085_s6 = smov 64   ;;  %v90_v14 = vld [vmem:[#allocation5 + $0xb8] sm:$0xff]  ;;  %vm148_vm1 = vcmask 130048   ;;  %vm173_vm2 = vcmask 64512  }
  0x11   :  { %v81_v4 = vld [vmem:[#allocation5 + $0x70] sm:$0xff]  ;;  %v79_v5 = vld [vmem:[#allocation5 + $0x60] sm:$0xff]  ;;  %v88_v15 = vld [vmem:[#allocation5 + $0xa8] sm:$0xff]  ;;  %125 = vmatpush.msra.mxu1 %v90_v14  ;;  %s1086_s7 = smov 32   ;;  %s1087_s8 = smov 96  }
  0x12   :  { %103 = vmatpush.msra.mxu0 %v87_v1  ;;  %v77_v6 = vld [vmem:[#allocation5 + $0x50] sm:$0xff]  ;;  %v75_v7 = vld [vmem:[#allocation5 + $0x40] sm:$0xff]  ;;  %v86_v16 = vld [vmem:[#allocation5 + $0x98] sm:$0xff]  ;;  %s1088_s9 = smov 80   ;;  %s1089_s10 = smov 48  }
  0x13   :  { %v73_v8 = vld [vmem:[#allocation5 + $0x30] sm:$0xff]  ;;  %v71_v9 = vld [vmem:[#allocation5 + $0x20] sm:$0xff]  ;;  %126 = vmatpush.msra.mxu1 %v88_v15  ;;  %v84_v17 = vld [vmem:[#allocation5 + $0x88] sm:$0xff]  ;;  %s878_s16 = sshll.u32 %s1267_s4, 4  ;;  %s879_s16 = int_to_ptr.hbm [resolvable:$true] %s878_s16 }
  0x14   :  { %104 = vmatpush.msra.mxu0 %v85_v2  ;;  %v69_v10 = vld [vmem:[#allocation5 + $0x10] sm:$0xff]  ;;  %v67_v11 = vld [vmem:[#allocation5] sm:$0xff]  ;;  %v82_v18 = vld [vmem:[#allocation5 + $0x78] sm:$0xff] }
  0x15   :  { %v65_v12 = vld [vmem:[#allocation2] sm:$0xff]  ;;  %127 = vmatpush.msra.mxu1 %v86_v16  ;;  %v80_v19 = vld [vmem:[#allocation5 + $0x68] sm:$0xff]  ;;  %v78_v20 = vld [vmem:[#allocation5 + $0x58] sm:$0xff] }
  0x16   :  { %105 = vmatpush.msra.mxu0 %v83_v3  ;;  %v76_v21 = vld [vmem:[#allocation5 + $0x48] sm:$0xff]  ;;  %v74_v22 = vld [vmem:[#allocation5 + $0x38] sm:$0xff]  ;;  %v1155_v40 = vld [vmem:[#allocation7 + $0x10] sm:$0xff] }
  0x17   :  { %128 = vmatpush.msra.mxu1 %v84_v17  ;;  %v72_v23 = vld [vmem:[#allocation5 + $0x28] sm:$0xff]  ;;  %v70_v24 = vld [vmem:[#allocation5 + $0x18] sm:$0xff]  ;;  %v1166_v53 = vld [vmem:[#allocation7] sm:$0xff] }
  0x18   :  { %106 = vmatpush.msra.mxu0 %v81_v4  ;;  %v68_v25 = vld [vmem:[#allocation5 + $0x8] sm:$0xff]  ;;  %v1151_v38 = vld [vmem:[#allocation7 + $0x18] sm:$0xff] }
  0x19   :  { %129 = vmatpush.msra.mxu1 %v82_v18  ;;  %v1164_v52 = vld [vmem:[#allocation7 + $0x8] sm:$0xff]  ;;  %v66_v0 = vld [vmem:[#allocation2 + $0x8] sm:$0xff] }
  0x1a   :  { %107 = vmatpush.msra.mxu0 %v79_v5 }
  0x1b   :  { %130 = vmatpush.msra.mxu1 %v80_v19 }
  0x1c   :  { %108 = vmatpush.msra.mxu0 %v77_v6 }
  0x1d   :  { %131 = vmatpush.msra.mxu1 %v78_v20 }
  0x1e   :  { %109 = vmatpush.msra.mxu0 %v75_v7  ;;  %v390_v7 = vld [vmem:[#allocation7 + $0x28] sm:$0xff] }
  0x1f   :  { %132 = vmatpush.msra.mxu1 %v76_v21 }
  0x20   :  { %110 = vmatpush.msra.mxu0 %v73_v8 }
  0x21   :  { %133 = vmatpush.msra.mxu1 %v74_v22 }
  0x22   :  { %111 = vmatpush.msra.mxu0 %v71_v9 }
  0x23   :  { %134 = vmatpush.msra.mxu1 %v72_v23 }
  0x24   :  { %112 = vmatpush.msra.mxu0 %v69_v10 }
  0x25   :  { %135 = vmatpush.msra.mxu1 %v70_v24 }
  0x26   :  { %113 = vmatpush.msra.mxu0 %v67_v11 }
  0x27   :  { %892 = vmatmul.msk.f32.vlgmr.msra.gmra.mxu0 %vm91_vm0, %v65_v12  ;;  %136 = vmatpush.msra.mxu1 %v68_v25 }
  0x28   :  { %894 = vmatmul.msk.f32.vlgmr.msra.gmra.mxu1 %vm91_vm0, %v65_v12  ;;  %v389_v12 = vld [vmem:[#allocation7 + $0x20] sm:$0xff] }
  0x2f   :  { %893 = vmatmul.msk.f32.gmra.mxu0 %vm91_vm0, %v66_v0 }
  0x30   :  { %895 = vmatmul.msk.f32.gmra.mxu1 %vm91_vm0, %v66_v0 }
  0xa4   :  { %v115_v13 = vpop.f32.mrf.mxu0 }
  0xa5   :  { %210 = vrot.lane.b32.xlu2 %v115_v13, %s1084_s2  ;;  %146 = vrot.lane.b32.xlu0 %v115_v13, %s1085_s6  ;;  %v1138_v27 = vpop.f32.mrf.mxu1 }
  0xa6   :  { %203 = vmatpush.msra.mxu3 %v1138_v27 }
  0xac   :  { %v1179_v6 = vpop.f32.mrf.mxu0 }
  0xff   :  { %v211_v41 = vpop.permute.xlu2 %210 }
 0x117   :  { %v147_v26 = vpop.permute.xlu0 %146 }
 0x118   :  { %896 = vmatpush.xpose.msk.msra.mxu2 %vm148_vm1, %v147_v26 }
 0x11b   :  { %897 = vmatmul.msk.f32.vlgmr.msra.gmra.mxu2 %vm148_vm1, %v115_v13 }
 0x19e   :  { %v170_v28 = vpop.f32.mrf.mxu2 }
 0x19f   :  { %v174_v29 = vsel %vm173_vm2, %v170_v28, -inf }
 0x1a0   :  { %175 = vmax.xlane.f32.xlu0 %v174_v29 }
 0x1b4   :  { %326 = vrot.lane.b32.xlu0 %v115_v13, %s1086_s7 }
 0x1bc   :  { %324 = vrot.lane.b32.xlu0 %v115_v13, %s1087_s8 }
 0x1c4   :  { %363 = vrot.lane.b32.xlu0 %v1138_v27, %s1087_s8 }
 0x1cc   :  { %417 = vrot.lane.b32.xlu0 %v115_v13, %s1079_s24 }
 0x1d4   :  { %415 = vrot.lane.b32.xlu0 %v115_v13, %s1088_s9 }
 0x213   :  { %v176_v30 = vpop.xlane.xlu0 %175 }
 0x214   :  { %v177_v31 = vsub.f32 %v170_v28, %v176_v30 }
 0x216   :  { %v178_v32 = vmul.f32 1.442695, %v177_v31 }
 0x218   :  { %943 = vpow2.f32 %v178_v32 }
 0x21e   :  { %v944_v33 = vpop.eup %943 }
 0x21f   :  { %v180_v34 = vsel %vm173_vm2, %v944_v33, 0.0 }
 0x220   :  { %181 = vadd.xlane.f32.xlu1 %v180_v34 }
 0x226   :  { %v327_v42 = vpop.permute.xlu0 %326 }
 0x22e   :  { %v325_v54 = vpop.permute.xlu0 %324 }
 0x236   :  { %v364_v57 = vpop.permute.xlu0 %363 }
 0x239   :  { %212 = vrot.lane.b32.xlu1 %v115_v13, %s1089_s10 }
 0x23e   :  { %v418_v59 = vpop.permute.xlu0 %417 }
 0x246   :  { %v416_v11 = vpop.permute.xlu0 %415 }
 0x293   :  { %v182_v35 = vpop.xlane.xlu1 %181 }
 0x294   :  { %945 = vrcp.f32 %v182_v35 }
 0x29a   :  { %v946_v36 = vpop.eup %945 }
 0x29b   :  { %v184_v37 = vmul.f32 %v946_v36, %v944_v33 }
 0x29d   :  { %898 = vmatmul.msk.f32.vlgmr.msra.gmra.mxu3 %vm173_vm2, %v184_v37 }
 0x2ab   :  { %v213_v39 = vpop.permute.xlu1 %212 }
 0x2ac   :  { %899 = vmatpush.xpose.msk.msrb.mxu3 %vm148_vm1, %v213_v39  ;;  %v1212_v39 = vld [vmem:[#allocation7 + $0x38] sm:$0xff] }
 0x2ad   :  { %499 = vmatpush.msrb.mxu1 %v1212_v39 }
 0x2af   :  { %900 = vmatmul.msk.f32.vlgmr.msrb.gmra.mxu3 %vm148_vm1, %v211_v41  ;;  %v1218_v41 = vpop.f32.mrf.mxu1 }
 0x2b0   :  { %295 = vmatpush.msra.mxu3 %v1151_v38 }
 0x2b2   :  { %296 = vmatpush.msra.mxu3 %v1155_v40 }
 0x2b4   :  { %904 = vmatpush.xpose.msk.msrb.mxu3 %vm148_vm1, %v327_v42 }
 0x320   :  { %v205_v43 = vpop.f32.mrf.mxu3 }
 0x332   :  { %v235_v44 = vpop.f32.mrf.mxu3 }
 0x333   :  { %v238_v45 = vsel %vm173_vm2, %v235_v44, -inf }
 0x334   :  { %239 = vmax.xlane.f32.xlu2 %v238_v45 }
 0x34c   :  { %250 = vrot.lane.b32.xlu2 %v1138_v27, %s1084_s2 }
 0x3a7   :  { %v240_v46 = vpop.xlane.xlu2 %239 }
 0x3a8   :  { %v241_v47 = vsub.f32 %v235_v44, %v240_v46 }
 0x3aa   :  { %v242_v48 = vmul.f32 1.442695, %v241_v47 }
 0x3ac   :  { %947 = vpow2.f32 %v242_v48 }
 0x3af   :  { %v251_v49 = vpop.permute.xlu2 %250 }
 0x3b0   :  { %271 = vmatpush.msrb.mxu2 %v251_v49  ;;  %v1231_v49 = vld [vmem:[%s1266_s3] ss:$0 sm:$0xff]  ;;  %s1090_s3 = smov [#allocation8]  }
 0x3b1   :  { %s876_s13 = sshll.u32 %s1090_s3, 4  ;;  %s877_s13 = int_to_ptr.vmem [resolvable:$true] %s876_s13 }
 0x3b2   :  { %v948_v50 = vpop.eup %947  ;;  %318 = vmatpush.msra.mxu2 %v1164_v52 }
 0x3b3   :  { %v244_v51 = vsel %vm173_vm2, %v948_v50, 0.0 }
 0x3b4   :  { %245 = vadd.xlane.f32.xlu1 %v244_v51  ;;  %319 = vmatpush.msra.mxu2 %v1166_v53 }
 0x427   :  { %v246_v55 = vpop.xlane.xlu1 %245 }
 0x428   :  { %949 = vrcp.f32 %v246_v55 }
 0x42e   :  { %v950_v56 = vpop.eup %949 }
 0x42f   :  { %v248_v58 = vmul.f32 %v950_v56, %v948_v50 }
 0x431   :  { %901 = vmatmul.msk.f32.vlgmr.msrb.gmra.mxu2 %vm173_vm2, %v248_v58 }
 0x432   :  { %384 = vmatpush.msrb.mxu2 %v364_v57 }
 0x439   :  { %903 = vmatmul.msk.f32.vlgmr.msra.gmra.mxu2 %vm148_vm1, %v205_v43 }
 0x43a   :  { %908 = vmatpush.xpose.msk.msra.mxu2 %vm148_vm1, %v418_v59 }
 0x4b4   :  { %v273_v60 = vpop.f32.mrf.mxu2 }
 0x4b5   :  { %902 = vmatmul.msk.f32.vlgmr.msra.gmra.mxu3 %vm148_vm1, %v273_v60 }
 0x4b6   :  { %408 = vmatpush.msra.mxu3 %v390_v7 }
 0x4b8   :  { %409 = vmatpush.msra.mxu3 %v389_v12 }
 0x4bc   :  { %v321_v14 = vpop.f32.mrf.mxu2 }
 0x4bd   :  { %905 = vmatmul.msk.f32.vlgmr.msrb.gmra.mxu3 %vm148_vm1, %v325_v54 }
 0x538   :  { %v298_v61 = vpop.f32.mrf.mxu3 }
 0x539   :  { %v322_v21 = vadd.f32 %v321_v14, %v298_v61 }
 0x540   :  { %v349_v62 = vpop.f32.mrf.mxu3 }
 0x541   :  { %v352_v63 = vsel %vm173_vm2, %v349_v62, -inf }
 0x542   :  { %353 = vmax.xlane.f32.xlu2 %v352_v63 }
 0x5b5   :  { %v354_v1 = vpop.xlane.xlu2 %353 }
 0x5b6   :  { %v355_v2 = vsub.f32 %v349_v62, %v354_v1 }
 0x5b8   :  { %v356_v3 = vmul.f32 1.442695, %v355_v2 }
 0x5ba   :  { %951 = vpow2.f32 %v356_v3 }
 0x5c0   :  { %v952_v4 = vpop.eup %951 }
 0x5c1   :  { %v358_v5 = vsel %vm173_vm2, %v952_v4, 0.0 }
 0x5c2   :  { %359 = vadd.xlane.f32.xlu1 %v358_v5 }
 0x5db   :  { %512 = vrot.lane.b32.xlu1 %v1179_v6, %s1085_s6 }
 0x635   :  { %v360_v8 = vpop.xlane.xlu1 %359 }
 0x636   :  { %953 = vrcp.f32 %v360_v8 }
 0x63c   :  { %v954_v9 = vpop.eup %953 }
 0x63d   :  { %v362_v10 = vmul.f32 %v954_v9, %v952_v4 }
 0x63f   :  { %906 = vmatmul.msk.f32.vlgmr.msrb.gmra.mxu2 %vm173_vm2, %v362_v10 }
 0x640   :  { %567 = vmatpush.msrb.mxu2 %v1218_v41 }
 0x647   :  { %909 = vmatmul.msk.f32.vlgmr.msra.gmra.mxu2 %vm148_vm1, %v416_v11 }
 0x648   :  { %682 = vmatpush.msra.mxu2 %v1164_v52 }
 0x64a   :  { %683 = vmatpush.msra.mxu2 %v1166_v53 }
 0x64d   :  { %v513_v13 = vpop.permute.xlu1 %512 }
 0x64e   :  { %912 = vmatpush.xpose.msk.msrb.mxu3 %vm148_vm1, %v513_v13 }
 0x6c2   :  { %v386_v15 = vpop.f32.mrf.mxu2 }
 0x6c3   :  { %907 = vmatmul.msk.f32.vlgmr.msra.gmra.mxu3 %vm148_vm1, %v386_v15 }
 0x6c4   :  { %659 = vmatpush.msra.mxu3 %v1151_v38 }
 0x6c6   :  { %660 = vmatpush.msra.mxu3 %v1155_v40  ;;  %v1215_v40 = vld [vmem:[#allocation7 + $0x30] sm:$0xff] }
 0x6c7   :  { %500 = vmatpush.msrb.mxu1 %v1215_v40 }
 0x6ca   :  { %v440_v16 = vpop.f32.mrf.mxu2 }
 0x6cb   :  { %913 = vmatmul.msk.f32.vlgmr.msrb.gmra.mxu3 %vm148_vm1, %v1179_v6  ;;  %v443_v17 = vsel %vm173_vm2, %v440_v16, -inf }
 0x6cc   :  { %444 = vmax.xlane.f32.xlu2 %v443_v17  ;;  %772 = vmatpush.msrb.mxu3 %v390_v7 }
 0x6ce   :  { %773 = vmatpush.msrb.mxu3 %v389_v12 }
 0x73f   :  { %v445_v18 = vpop.xlane.xlu2 %444 }
 0x740   :  { %v446_v19 = vsub.f32 %v440_v16, %v445_v18 }
 0x742   :  { %v447_v20 = vmul.f32 1.442695, %v446_v19 }
 0x744   :  { %955 = vpow2.f32 %v447_v20 }
 0x746   :  { %v411_v22 = vpop.f32.mrf.mxu3 }
 0x747   :  { %v414_v23 = vadd.f32 %v411_v22, %v322_v21 }
 0x74a   :  { %v956_v24 = vpop.eup %955 }
 0x74b   :  { %v449_v25 = vsel %vm173_vm2, %v956_v24, 0.0 }
 0x74c   :  { %450 = vadd.xlane.f32.xlu2 %v449_v25 }
 0x74e   :  { %v535_v26 = vpop.f32.mrf.mxu3 }
 0x74f   :  { %v538_v28 = vsel %vm173_vm2, %v535_v26, -inf }
 0x750   :  { %539 = vmax.xlane.f32.xlu0 %v538_v28 }
 0x764   :  { %454 = vrot.lane.b32.xlu2 %v1138_v27, %s1088_s9  ;;  %576 = vrot.lane.b32.xlu0 %v1179_v6, %s1089_s10 }
 0x76c   :  { %690 = vrot.lane.b32.xlu2 %v1179_v6, %s1086_s7  ;;  %688 = vrot.lane.b32.xlu0 %v1179_v6, %s1087_s8 }
 0x774   :  { %781 = vrot.lane.b32.xlu2 %v1179_v6, %s1079_s24 }
 0x77c   :  { %779 = vrot.lane.b32.xlu2 %v1179_v6, %s1088_s9 }
 0x7bf   :  { %v451_v29 = vpop.xlane.xlu2 %450 }
 0x7c0   :  { %957 = vrcp.f32 %v451_v29 }
 0x7c3   :  { %v540_v30 = vpop.xlane.xlu0 %539 }
 0x7c4   :  { %v541_v31 = vsub.f32 %v535_v26, %v540_v30 }
 0x7c6   :  { %v958_v27 = vpop.eup %957  ;;  %v542_v32 = vmul.f32 1.442695, %v541_v31 }
 0x7c7   :  { %v455_v33 = vpop.permute.xlu2 %454  ;;  %v453_v34 = vmul.f32 %v958_v27, %v956_v24 }
 0x7c8   :  { %959 = vpow2.f32 %v542_v32  ;;  %475 = vmatpush.msrb.mxu0 %v455_v33 }
 0x7c9   :  { %910 = vmatmul.msk.f32.vlgmr.msrb.gmra.mxu0 %vm173_vm2, %v453_v34 }
 0x7ce   :  { %v960_v35 = vpop.eup %959 }
 0x7cf   :  { %v544_v36 = vsel %vm173_vm2, %v960_v35, 0.0  ;;  %v691_v38 = vpop.permute.xlu2 %690 }
 0x7d0   :  { %545 = vadd.xlane.f32.xlu1 %v544_v36 }
 0x7d6   :  { %v577_v37 = vpop.permute.xlu0 %576 }
 0x7d7   :  { %915 = vmatpush.xpose.msk.msra.mxu0 %vm148_vm1, %v577_v37  ;;  %v782_v46 = vpop.permute.xlu2 %781 }
 0x7db   :  { %920 = vmatpush.xpose.msk.msrb.mxu0 %vm148_vm1, %v691_v38 }
 0x7de   :  { %v689_v48 = vpop.permute.xlu0 %688 }
 0x7df   :  { %v780_v54 = vpop.permute.xlu2 %779 }
 0x7e9   :  { %574 = vrot.lane.b32.xlu1 %v1179_v6, %s1084_s2 }
 0x843   :  { %v546_v42 = vpop.xlane.xlu1 %545 }
 0x844   :  { %961 = vrcp.f32 %v546_v42 }
 0x846   :  { %v477_v43 = vpop.f32.mrf.mxu0 }
 0x847   :  { %911 = vmatmul.msk.f32.vlgmr.msrb.gmra.mxu1 %vm148_vm1, %v477_v43 }
 0x84a   :  { %v962_v44 = vpop.eup %961 }
 0x84b   :  { %v548_v45 = vmul.f32 %v962_v44, %v960_v35 }
 0x84d   :  { %914 = vmatmul.msk.f32.vlgmr.msrb.gmra.mxu2 %vm173_vm2, %v548_v45 }
 0x84e   :  { %924 = vmatpush.xpose.msk.msrb.mxu2 %vm148_vm1, %v782_v46 }
 0x85b   :  { %v575_v47 = vpop.permute.xlu1 %574 }
 0x85c   :  { %916 = vmatmul.msk.f32.vlgmr.msra.gmra.mxu0 %vm148_vm1, %v575_v47 }
 0x864   :  { %921 = vmatmul.msk.f32.vlgmr.msrb.gmra.mxu0 %vm148_vm1, %v689_v48 }
 0x8c4   :  { %v502_v50 = vpop.f32.mrf.mxu1 }
 0x8c5   :  { %v505_v51 = vadd.f32 %v502_v50, %v414_v23 }
 0x8c7   :  { %v509_v52 = vadd.f32 %v1231_v49, %v505_v51 }
 0x8c9   :  { %510 = vst [vmem:[#allocation8] sm:$0xff] %v509_v52 }
 0x8d0   :  { %v569_v53 = vpop.f32.mrf.mxu2 }
 0x8d1   :  { %919 = vmatmul.msk.f32.vlgmr.msra.gmra.mxu2 %vm148_vm1, %v569_v53 }
 0x8d9   :  { %v599_v55 = vpop.f32.mrf.mxu0  ;;  %925 = vmatmul.msk.f32.vlgmr.msrb.gmra.mxu2 %vm148_vm1, %v780_v54 }
 0x8da   :  { %v602_v56 = vsel %vm173_vm2, %v599_v55, -inf }
 0x8db   :  { %603 = vmax.xlane.f32.xlu0 %v602_v56 }
 0x8e1   :  { %v713_v57 = vpop.f32.mrf.mxu0 }
 0x8e2   :  { %v716_v58 = vsel %vm173_vm2, %v713_v57, -inf }
 0x8e3   :  { %717 = vmax.xlane.f32.xlu1 %v716_v58 }
 0x94e   :  { %v604_v59 = vpop.xlane.xlu0 %603 }
 0x94f   :  { %v605_v60 = vsub.f32 %v599_v55, %v604_v59 }
 0x951   :  { %v606_v61 = vmul.f32 1.442695, %v605_v60 }
 0x953   :  { %963 = vpow2.f32 %v606_v61 }
 0x954   :  { %v685_v62 = vpop.f32.mrf.mxu2 }
 0x956   :  { %v718_v63 = vpop.xlane.xlu1 %717 }
 0x957   :  { %v719_v0 = vsub.f32 %v713_v57, %v718_v63 }
 0x959   :  { %v964_v1 = vpop.eup %963  ;;  %v720_v2 = vmul.f32 1.442695, %v719_v0 }
 0x95a   :  { %v608_v3 = vsel %vm173_vm2, %v964_v1, 0.0 }
 0x95b   :  { %965 = vpow2.f32 %v720_v2  ;;  %609 = vadd.xlane.f32.xlu0 %v608_v3 }
 0x95c   :  { %v804_v4 = vpop.f32.mrf.mxu2 }
 0x95d   :  { %v807_v5 = vsel %vm173_vm2, %v804_v4, -inf }
 0x95e   :  { %808 = vmax.xlane.f32.xlu2 %v807_v5 }
 0x961   :  { %v966_v6 = vpop.eup %965 }
 0x962   :  { %v722_v7 = vsel %vm173_vm2, %v966_v6, 0.0 }
 0x963   :  { %723 = vadd.xlane.f32.xlu1 %v722_v7 }
 0x976   :  { %614 = vrot.lane.b32.xlu2 %v1218_v41, %s1084_s2 }
 0x97c   :  { %727 = vrot.lane.b32.xlu1 %v1218_v41, %s1087_s8 }
 0x9ce   :  { %v610_v8 = vpop.xlane.xlu0 %609 }
 0x9cf   :  { %967 = vrcp.f32 %v610_v8 }
 0x9d1   :  { %v809_v9 = vpop.xlane.xlu2 %808 }
 0x9d2   :  { %v810_v10 = vsub.f32 %v804_v4, %v809_v9 }
 0x9d4   :  { %v811_v11 = vmul.f32 1.442695, %v810_v10 }
 0x9d5   :  { %v968_v12 = vpop.eup %967 }
 0x9d6   :  { %969 = vpow2.f32 %v811_v11  ;;  %v612_v13 = vmul.f32 %v968_v12, %v964_v1  ;;  %v724_v17 = vpop.xlane.xlu1 %723 }
 0x9d7   :  { %971 = vrcp.f32 %v724_v17 }
 0x9d9   :  { %v615_v14 = vpop.permute.xlu2 %614 }
 0x9da   :  { %635 = vmatpush.msra.mxu1 %v615_v14 }
 0x9db   :  { %917 = vmatmul.msk.f32.vlgmr.msra.gmra.mxu1 %vm173_vm2, %v612_v13 }
 0x9dc   :  { %v970_v15 = vpop.eup %969 }
 0x9dd   :  { %v813_v16 = vsel %vm173_vm2, %v970_v15, 0.0  ;;  %v972_v18 = vpop.eup %971 }
 0x9de   :  { %814 = vadd.xlane.f32.xlu0 %v813_v16  ;;  %v726_v19 = vmul.f32 %v972_v18, %v966_v6 }
 0x9ee   :  { %v728_v20 = vpop.permute.xlu1 %727 }
 0x9ef   :  { %748 = vmatpush.msrb.mxu1 %v728_v20 }
 0x9f0   :  { %922 = vmatmul.msk.f32.vlgmr.msrb.gmra.mxu1 %vm173_vm2, %v726_v19 }
 0x9f1   :  { %863 = vmatpush.msra.mxu1 %v1212_v39 }
 0x9f2   :  { %818 = vrot.lane.b32.xlu0 %v1218_v41, %s1088_s9 }
 0x9f3   :  { %864 = vmatpush.msra.mxu1 %v1215_v40 }
 0xa51   :  { %v815_v21 = vpop.xlane.xlu0 %814 }
 0xa52   :  { %973 = vrcp.f32 %v815_v21 }
 0xa58   :  { %v637_v22 = vpop.f32.mrf.mxu1  ;;  %v974_v23 = vpop.eup %973 }
 0xa59   :  { %918 = vmatmul.msk.f32.vlgmr.msra.gmra.mxu3 %vm148_vm1, %v637_v22  ;;  %v817_v24 = vmul.f32 %v974_v23, %v970_v15 }
 0xa64   :  { %v819_v25 = vpop.permute.xlu0 %818 }
 0xa65   :  { %839 = vmatpush.msra.mxu0 %v819_v25 }
 0xa66   :  { %926 = vmatmul.msk.f32.vlgmr.msra.gmra.mxu0 %vm173_vm2, %v817_v24 }
 0xa6d   :  { %v750_v26 = vpop.f32.mrf.mxu1 }
 0xa6e   :  { %923 = vmatmul.msk.f32.vlgmr.msrb.gmra.mxu3 %vm148_vm1, %v750_v26 }
 0xadc   :  { %v662_v29 = vpop.f32.mrf.mxu3 }
 0xadd   :  { %v686_v31 = vadd.f32 %v685_v62, %v662_v29 }
 0xae3   :  { %v841_v28 = vpop.f32.mrf.mxu0 }
 0xae4   :  { %927 = vmatmul.msk.f32.vlgmr.msra.gmra.mxu1 %vm148_vm1, %v841_v28 }
 0xaf1   :  { %v775_v30 = vpop.f32.mrf.mxu3 }
 0xaf2   :  { %v778_v27 = vadd.f32 %v775_v30, %v686_v31 }
 0xb61   :  { %v866_v32 = vpop.f32.mrf.mxu1 }
 0xb62   :  { %v869_v33 = vadd.f32 %v866_v32, %v778_v27 }
 0xb64   :  { %v870_v34 = vadd.f32 %v1231_v49, %v869_v33 }
 0xb66   :  { %871 = vst [vmem:[#allocation8 + $0x8] sm:$0xff] %v870_v34 }
 0xb67   :  { %884 = dma.vmem_to_hbm [thread:$0]  %s877_s13, 256, %s879_s16, [#allocation4], %s1081_s27, %s1081_s27, %s1082_s28  }
 0xb68   :  { %1075 = dma.done.wait [#allocation4], 256  }
 0xb69   :  { %1076 = vsyncadd [#allocation4], 4294967040 }
 0xb6a   :  { %889 = vsyncpa [#allocation3], 1 }
 0xb6b   :  { %890 = vsyncpa [#allocation6], 1 }
 0xb6c   :  { %891 = vsyncpa [#allocation4], 1 }

</bundles_post_ra>
